<compile_context>
chip_gen: v5e
topology: v5e:2x2
jax: 0.10.0
libtpu: 0.0.40
codegen_flags: <defaults>
</compile_context>

<pallas_src>
import functools

import jax
import jax.numpy as jnp
from jax.experimental import pallas as pl
from jax.experimental.pallas import tpu as pltpu


# ----------------------------------------------------------------------------
# Kernels
# ----------------------------------------------------------------------------
def _kernel_masked(x_ref, m_ref, w1_ref, b1_ref, w2_ref, b2_ref, o_ref):
    # x_ref : (BB, N, Din)      m_ref : (BB, N, 1)  f32
    # w*_ref: (Din, Dp)         b*_ref: (1, Dp)     f32
    # o_ref : (BB, N, Dp)
    bb, n, din = x_ref.shape
    dp = o_ref.shape[-1]

    x = x_ref[...]
    m = m_ref[...]

    # y1 = x @ W1 + b1 on the collapsed (BB*N, Din) tile (free layout view,
    # since N is a sublane multiple).
    y1 = jnp.dot(x.reshape(bb * n, din), w1_ref[...],
                 preferred_element_type=jnp.float32)
    y1 = (y1 + b1_ref[...]).reshape(bb, n, dp)

    # y2 = (unmasked set sum) @ W2 + b2, one row per set.
    s = jnp.sum(x, axis=1)                                       # (BB, Din)
    y2 = jnp.dot(s, w2_ref[...], preferred_element_type=jnp.float32)
    y2 = (y2 + b2_ref[...]).reshape(bb, 1, dp)                   # (BB, 1, Dp)

    # inv = 1 / sum(mask);  out = (y1 + y2 * inv) * m   == y1*m + y2*m/msum
    msum = jnp.sum(m, axis=1, keepdims=True)                     # (BB, 1, 1)
    inv = 1.0 / msum
    o_ref[...] = ((y1 + y2 * inv) * m).astype(o_ref.dtype)


def _kernel_unmasked(x_ref, w1_ref, b1_ref, w2_ref, b2_ref, o_ref, *, inv_n):
    # Specialized path: no mask stream, no msum reduction, no final multiply.
    bb, n, din = x_ref.shape
    dp = o_ref.shape[-1]

    x = x_ref[...]

    y1 = jnp.dot(x.reshape(bb * n, din), w1_ref[...],
                 preferred_element_type=jnp.float32)
    y1 = (y1 + b1_ref[...]).reshape(bb, n, dp)

    s = jnp.sum(x, axis=1)                                       # (BB, Din)
    y2 = jnp.dot(s, w2_ref[...], preferred_element_type=jnp.float32)
    y2 = ((y2 + b2_ref[...]) * inv_n).reshape(bb, 1, dp)         # (BB, 1, Dp)

    o_ref[...] = (y1 + y2).astype(o_ref.dtype)


# ----------------------------------------------------------------------------
# Hardware / feature probes
# ----------------------------------------------------------------------------
def _round_up(a, b):
    return (a + b - 1) // b * b


@functools.lru_cache(maxsize=1)
def _tpu_generation_info():
    """Returns (vmem_capacity_bytes, num_tensorcores_per_chip)."""
    vmem = None
    try:
        vmem = int(pltpu.get_tpu_info().vmem_capacity_bytes)
    except Exception:
        vmem = None
    kind = ""
    try:
        kind = jax.devices()[0].device_kind.lower()
    except Exception:
        kind = ""
    if vmem is None:
        # Conservative fallback (assume the smallest VMEM generation).
        vmem = 64 * 1024 * 1024 if ("v7" in kind or not kind) else 128 * 1024 * 1024
    num_tc = 2 if ("v7" in kind or vmem <= 64 * 1024 * 1024) else 1
    return vmem, num_tc


def _probe_kernel(a_ref, w_ref, o_ref):
    o_ref[...] = a_ref[...] + w_ref[...]


@functools.lru_cache(maxsize=1)
def _single_buffer_supported():
    """One-time probe: does this JAX/Mosaic accept pl.Buffered(1) on a
    constant-index block?  The probe kernel is tiny and isolated, so this
    cannot mask errors of the real kernel."""
    if not hasattr(pl, "Buffered"):
        return False
    try:
        probe = pl.pallas_call(
            _probe_kernel,
            out_shape=jax.ShapeDtypeStruct((16, 128), jnp.float32),
            grid=(2,),
            in_specs=[
                pl.BlockSpec((8, 128), lambda i: (i, 0)),
                pl.BlockSpec((8, 128), lambda i: (0, 0),
                             pipeline_mode=pl.Buffered(1)),
            ],
            out_specs=pl.BlockSpec((8, 128), lambda i: (i, 0)),
        )
        jax.jit(probe).lower(
            jax.ShapeDtypeStruct((16, 128), jnp.float32),
            jax.ShapeDtypeStruct((8, 128), jnp.float32)).compile()
        return True
    except Exception:
        return False


# ----------------------------------------------------------------------------
# Tiling / VMEM model
# ----------------------------------------------------------------------------
def _tile_bytes(rows, cols, itemsize):
    """On-chip bytes of a (rows, cols) tile: sublane rounded to 8/16/32,
    lane rounded to 128."""
    sub = max(1, 32 // itemsize)
    return _round_up(max(rows, 1), sub) * _round_up(max(cols, 1), 128) * itemsize


def _pick_block_batch(B, N, Din, Dp, x_item, out_item, w_item, masked,
                      single_buffer):
    """Sets per grid step + vmem_limit_bytes.

    BB is sized from (a) a ~3 MiB-per-step HBM traffic target and (b) a
    layout-aware VMEM budget derived from the chip generation; the grid>=2
    constraint applies only on 2-TensorCore parts."""
    vmem_cap, num_tc = _tpu_generation_info()
    cap = int(0.75 * vmem_cap)              # ~48 MiB on v7x, ~96 MiB on v5e/v6e

    # Weight / bias VMEM (x2 if the pipeliner double-buffers them).
    w_bytes = 2 * _tile_bytes(Din, Dp, w_item) + 2 * _tile_bytes(1, Dp, 4)
    w_bytes *= 1 if single_buffer else 2

    # Per-set VMEM: x / (mask) / out double-buffered + one f32 intermediate.
    per_set_vmem = 2 * (_tile_bytes(N, Din, x_item) + _tile_bytes(N, Dp, out_item))
    if masked:
        per_set_vmem += 2 * _tile_bytes(N, 1, 4)
    per_set_vmem += _tile_bytes(N, Dp, 4)          # f32 y1/epilogue intermediate

    headroom = 4 * 1024 * 1024                     # Mosaic scratch, spills
    data_budget = max(cap - w_bytes - headroom, 2 * 1024 * 1024)
    bb_vmem = max(1, data_budget // per_set_vmem)

    # HBM traffic target per step (~3 MiB of x + mask + out actually moved).
    per_set_hbm = N * Din * x_item + N * Dp * out_item + (N * 4 if masked else 0)
    bb_hbm = max(1, (3 * 1024 * 1024) // max(per_set_hbm, 1))

    bb = min(bb_vmem, bb_hbm, B)
    if num_tc >= 2 and B >= 2:
        bb = min(bb, -(-B // 2))                   # keep grid >= 2 on 2-TC parts
    bb = max(1, int(bb))

    needed = bb * per_set_vmem + w_bytes + 8 * 1024 * 1024
    vmem_limit = int(min(cap, max(needed, 32 * 1024 * 1024)))
    return bb, vmem_limit


# ----------------------------------------------------------------------------
# pallas_call builder + public wrapper
# ----------------------------------------------------------------------------
def _build_call(B, N, Din, Dp, BB, out_dtype, masked, inv_n, vmem_limit,
                single_buffer):
    grid = (pl.cdiv(B, BB),)

    def wspec(shape):
        if single_buffer:
            # Constant-index blocks: a single VMEM copy is enough.
            return pl.BlockSpec(shape, lambda b: (0, 0),
                                pipeline_mode=pl.Buffered(1))
        return pl.BlockSpec(shape, lambda b: (0, 0))

    in_specs = [pl.BlockSpec((BB, N, Din), lambda b: (b, 0, 0))]        # x
    if masked:
        in_specs.append(pl.BlockSpec((BB, N, 1), lambda b: (b, 0, 0)))  # mask
    in_specs += [wspec((Din, Dp)), wspec((1, Dp)),                      # W1, b1
                 wspec((Din, Dp)), wspec((1, Dp))]                      # W2, b2

    kernel = (_kernel_masked if masked
              else functools.partial(_kernel_unmasked, inv_n=inv_n))

    return pl.pallas_call(
        kernel,
        out_shape=jax.ShapeDtypeStruct((B, N, Dp), out_dtype),
        grid_spec=pltpu.PrefetchScalarGridSpec(
            num_scalar_prefetch=0,
            grid=grid,
            in_specs=in_specs,
            out_specs=pl.BlockSpec((BB, N, Dp), lambda b: (b, 0, 0)),
        ),
        compiler_params=pltpu.CompilerParams(
            dimension_semantics=("parallel",),
            vmem_limit_bytes=int(vmem_limit)),
    )


def equivariant_layer(x, w1, b1, w2, b2, mask=None):
    """x: (B, N, Din); w*: (Din, Dout) (already transposed from torch's
    (out, in) layout); b*: (Dout,); mask: optional (B, N, ...) — only
    mask[..., 0] is used, exactly like the PyTorch module."""
    B, N, Din = x.shape
    Dout = w1.shape[1]
    out_dtype = x.dtype
    x_item = jnp.dtype(x.dtype).itemsize
    out_item = jnp.dtype(out_dtype).itemsize
    w_item = jnp.dtype(w1.dtype).itemsize

    # Lane-dense output padding, gated: only when Dout >= 128 and the inflation
    # is modest (<= 25%). Small Dout keeps native width (masked stores).
    Dp = Dout
    if Dout % 128 != 0 and Dout >= 128:
        cand = _round_up(Dout, 128)
        if (cand - Dout) * 4 <= Dout:
            Dp = cand
    if Dp != Dout:
        pad = Dp - Dout
        w1 = jnp.pad(w1, ((0, 0), (0, pad)))
        w2 = jnp.pad(w2, ((0, 0), (0, pad)))
        b1 = jnp.pad(b1, (0, pad))
        b2 = jnp.pad(b2, (0, pad))

    # N -> sublane multiple so in-kernel reshapes are free layout views.
    sub = max(1, 32 // x_item)             # 8 (f32) / 16 (bf16) / 32 (int8)
    Np = _round_up(N, sub)
    n_padded = Np != N

    masked = (mask is not None) or n_padded
    m = None
    if masked:
        if mask is None:
            m = jnp.ones((B, N, 1), dtype=jnp.float32)
        else:
            m = mask[..., 0:1].astype(jnp.float32)
        if n_padded:
            m = jnp.pad(m, ((0, 0), (0, Np - N), (0, 0)))   # pad rows: mask = 0
    if n_padded:
        x = jnp.pad(x, ((0, 0), (0, Np - N), (0, 0)))       # pad rows: x = 0

    # x / W keep their native dtype (bf16 ok); biases & epilogue stay f32
    # (v5e-safe: no bf16 VPU there).
    b1_ = b1.reshape(1, Dp).astype(jnp.float32)
    b2_ = b2.reshape(1, Dp).astype(jnp.float32)

    single_buffer = _single_buffer_supported()
    BB, vmem_limit = _pick_block_batch(B, Np, Din, Dp, x_item, out_item, w_item,
                                       masked, single_buffer)

    call = _build_call(B, Np, Din, Dp, BB, out_dtype, masked,
                       inv_n=1.0 / N, vmem_limit=vmem_limit,
                       single_buffer=single_buffer)
    args = (x, m, w1, b1_, w2, b2_) if masked else (x, w1, b1_, w2, b2_)
    out = call(*args)

    if n_padded:
        out = out[:, :N, :]
    if Dp != Dout:
        out = out[..., :Dout]
    return out


# ----------------------------------------------------------------------------
# Reference + test
# ----------------------------------------------------------------------------
def _reference(x, w1, b1, w2, b2, mask=None):
    y1 = x @ w1 + b1
    y2 = jnp.sum(x, axis=-2, keepdims=True) @ w2 + b2
    if mask is not None:
        m = mask[..., 0:1]
        y1 = y1 * m
        y2 = y2 * m / jnp.sum(m, axis=-2, keepdims=True)
    else:
        y2 = y2 / x.shape[-2]
    return y1 + y2


if __name__ == "__main__":
    key = jax.random.PRNGKey(0)
    B, N, in_dim, out_dim = 2, 8, 16, 32

    kx, kw1, kb1, kw2, kb2, km = jax.random.split(key, 6)
    x = jax.random.normal(kx, (B, N, in_dim), dtype=jnp.float32)

    # torch nn.Linear weight is (out, in); we store the transposed (in, out).
    w1 = jax.random.normal(kw1, (in_dim, out_dim), dtype=jnp.float32) * 0.1
    b1 = jax.random.normal(kb1, (out_dim,), dtype=jnp.float32) * 0.1
    w2 = jax.random.normal(kw2, (in_dim, out_dim), dtype=jnp.float32) * 0.1
    b2 = jax.random.normal(kb2, (out_dim,), dtype=jnp.float32) * 0.1

    # Unmasked path
    out = equivariant_layer(x, w1, b1, w2, b2, mask=None)
    out = jax.block_until_ready(out)
    ref = _reference(x, w1, b1, w2, b2, mask=None)
    assert out.shape == ref.shape, (out.shape, ref.shape)
    assert jnp.allclose(out, ref, atol=1e-5, rtol=1e-5), "unmasked mismatch"

    # Masked path (binary mask over set elements)
    mask = (jax.random.uniform(km, (B, N, 1)) > 0.3).astype(jnp.float32)
    mask = mask.at[:, 0, :].set(1.0)  # avoid an all-zero set
    out_m = equivariant_layer(x, w1, b1, w2, b2, mask=mask)
    out_m = jax.block_until_ready(out_m)
    ref_m = _reference(x, w1, b1, w2, b2, mask=mask)
    assert jnp.allclose(out_m, ref_m, atol=1e-5, rtol=1e-5), "masked mismatch"

    print("KERNEL_OK")
</pallas_src>

<mosaic_0001>
module attributes {stable_mosaic.version = 11 : i64} {
  func.func @_kernel_unmasked(%arg0: i32, %arg1: memref<2x8x16xf32, #tpu.memory_space<vmem>>, %arg2: memref<16x32xf32, #tpu.memory_space<vmem>>, %arg3: memref<1x32xf32, #tpu.memory_space<vmem>>, %arg4: memref<16x32xf32, #tpu.memory_space<vmem>>, %arg5: memref<1x32xf32, #tpu.memory_space<vmem>>, %arg6: memref<2x8x32xf32, #tpu.memory_space<vmem>>) attributes {dimension_semantics = [#tpu.dimension_semantics<parallel>], iteration_bounds = array<i64: 1>, scalar_prefetch = 0 : i64, scratch_operands = 0 : i64, tpu.core_type = #tpu.core_type<tc>, window_params = [{transform_indices = @transform_0, window_bounds = array<i64: 2, 8, 16>}, {pipeline_mode = #tpu.pipeline_mode<synchronous>, transform_indices = @transform_1, window_bounds = array<i64: 16, 32>}, {pipeline_mode = #tpu.pipeline_mode<synchronous>, transform_indices = @transform_2, window_bounds = array<i64: 1, 32>}, {pipeline_mode = #tpu.pipeline_mode<synchronous>, transform_indices = @transform_3, window_bounds = array<i64: 16, 32>}, {pipeline_mode = #tpu.pipeline_mode<synchronous>, transform_indices = @transform_4, window_bounds = array<i64: 1, 32>}, {transform_indices = @transform_5, window_bounds = array<i64: 2, 8, 32>}]} {
    %c0 = arith.constant 0 : index
    %c0_0 = arith.constant 0 : index
    %c0_1 = arith.constant 0 : index
    %0 = vector.load %arg1[%c0, %c0_0, %c0_1] : memref<2x8x16xf32, #tpu.memory_space<vmem>>, vector<2x8x16xf32>
    %1 = vector.shape_cast %0 : vector<2x8x16xf32> to vector<16x16xf32>
    %c0_2 = arith.constant 0 : index
    %c0_3 = arith.constant 0 : index
    %2 = vector.load %arg2[%c0_2, %c0_3] : memref<16x32xf32, #tpu.memory_space<vmem>>, vector<16x32xf32>
    %cst = arith.constant dense<0.000000e+00> : vector<16x32xf32>
    %3 = tpu.matmul %1, %2, %cst {dimension_numbers = #tpu.dot_dimension_numbers<[1], [0], [0], [1], [0, 0, 1, 1], [], []>} : vector<16x16xf32>, vector<16x32xf32>, vector<16x32xf32> -> vector<16x32xf32>
    %c0_4 = arith.constant 0 : index
    %c0_5 = arith.constant 0 : index
    %4 = vector.load %arg3[%c0_4, %c0_5] : memref<1x32xf32, #tpu.memory_space<vmem>>, vector<1x32xf32>
    %5 = vector.broadcast %4 : vector<1x32xf32> to vector<16x32xf32>
    %6 = arith.addf %3, %5 : vector<16x32xf32>
    %7 = vector.shape_cast %6 : vector<16x32xf32> to vector<2x8x32xf32>
    %cst_6 = arith.constant dense<0.000000e+00> : vector<2x16xf32>
    %8 = vector.multi_reduction <add>, %0, %cst_6 [1] : vector<2x8x16xf32> to vector<2x16xf32>
    %c0_7 = arith.constant 0 : index
    %c0_8 = arith.constant 0 : index
    %9 = vector.load %arg4[%c0_7, %c0_8] : memref<16x32xf32, #tpu.memory_space<vmem>>, vector<16x32xf32>
    %cst_9 = arith.constant dense<0.000000e+00> : vector<2x32xf32>
    %10 = tpu.matmul %8, %9, %cst_9 {dimension_numbers = #tpu.dot_dimension_numbers<[1], [0], [0], [1], [0, 0, 1, 1], [], []>} : vector<2x16xf32>, vector<16x32xf32>, vector<2x32xf32> -> vector<2x32xf32>
    %c0_10 = arith.constant 0 : index
    %c0_11 = arith.constant 0 : index
    %11 = vector.load %arg5[%c0_10, %c0_11] : memref<1x32xf32, #tpu.memory_space<vmem>>, vector<1x32xf32>
    %12 = vector.broadcast %11 : vector<1x32xf32> to vector<2x32xf32>
    %13 = arith.addf %10, %12 : vector<2x32xf32>
    %cst_12 = arith.constant 1.250000e-01 : f32
    %14 = vector.broadcast %cst_12 : f32 to vector<2x32xf32>
    %15 = arith.mulf %13, %14 : vector<2x32xf32>
    %16 = vector.shape_cast %15 : vector<2x32xf32> to vector<2x1x32xf32>
    %17 = vector.broadcast %16 : vector<2x1x32xf32> to vector<2x8x32xf32>
    %18 = arith.addf %7, %17 : vector<2x8x32xf32>
    %c0_13 = arith.constant 0 : index
    %c0_14 = arith.constant 0 : index
    %c0_15 = arith.constant 0 : index
    %19 = vector.load %arg6[%c0_13, %c0_14, %c0_15] : memref<2x8x32xf32, #tpu.memory_space<vmem>>, vector<2x8x32xf32>
    tpu.vector_store %arg6[%c0_13, %c0_14, %c0_15], %18 {strides = array<i32>} : memref<2x8x32xf32, #tpu.memory_space<vmem>>, vector<2x8x32xf32>,
    return
  }
  func.func @transform_0(%arg0: i32) -> (i32, i32, i32) {
    %c0_i32 = arith.constant 0 : i32
    %c0_i32_0 = arith.constant 0 : i32
    %c0_i32_1 = arith.constant 0 : i32
    return %arg0, %c0_i32, %c0_i32_0 : i32, i32, i32
  }
  func.func @transform_1(%arg0: i32) -> (i32, i32) {
    %c0_i32 = arith.constant 0 : i32
    %c0_i32_0 = arith.constant 0 : i32
    %c0_i32_1 = arith.constant 0 : i32
    return %c0_i32, %c0_i32_0 : i32, i32
  }
  func.func @transform_2(%arg0: i32) -> (i32, i32) {
    %c0_i32 = arith.constant 0 : i32
    %c0_i32_0 = arith.constant 0 : i32
    %c0_i32_1 = arith.constant 0 : i32
    return %c0_i32, %c0_i32_0 : i32, i32
  }
  func.func @transform_3(%arg0: i32) -> (i32, i32) {
    %c0_i32 = arith.constant 0 : i32
    %c0_i32_0 = arith.constant 0 : i32
    %c0_i32_1 = arith.constant 0 : i32
    return %c0_i32, %c0_i32_0 : i32, i32
  }
  func.func @transform_4(%arg0: i32) -> (i32, i32) {
    %c0_i32 = arith.constant 0 : i32
    %c0_i32_0 = arith.constant 0 : i32
    %c0_i32_1 = arith.constant 0 : i32
    return %c0_i32, %c0_i32_0 : i32, i32
  }
  func.func @transform_5(%arg0: i32) -> (i32, i32, i32) {
    %c0_i32 = arith.constant 0 : i32
    %c0_i32_0 = arith.constant 0 : i32
    %c0_i32_1 = arith.constant 0 : i32
    return %arg0, %c0_i32, %c0_i32_0 : i32, i32, i32
  }
}

</mosaic_0001>

<bundles_post_ra>
// kernel: tpu_custom_call.1
= control target key start
LH: loop header
LB: loop body
LE: loop exit
PB: predicated region body
PF: predicated region fallthrough
CT: control target
= control target key end

     0   :  { %10 = vsyncpa [#allocation3], 0  ;;  %s370_s0 = inlined_call_operand.hbm [shape: f32[2,8,16], index: 0, kind: input, shape index: {}]   ;;  %s371_s1 = inlined_call_operand.hbm [shape: f32[16,32], index: 1, kind: input, shape index: {}]   ;;  %s372_s2 = inlined_call_operand.vmem [shape: f32[1,32], index: 2, kind: input, shape index: {}]   ;;  %s373_s3 = inlined_call_operand.hbm [shape: f32[16,32], index: 3, kind: input, shape index: {}]   ;;  %s374_s4 = inlined_call_operand.vmem [shape: f32[1,32], index: 4, kind: input, shape index: {}]   ;;  %s375_s5 = inlined_call_operand.hbm [shape: f32[2,8,32], index: 5, kind: output, shape index: {}]  }
   0x1   :  { %11 = vsyncpa [#allocation6], 0 }
   0x2   :  { %12 = vsyncpa [#allocation4], 0  ;;  %s30_s20 = sshll.u32 %s371_s1, 4  ;;  %s299_s21 = smov [#allocation5]   ;;  %s31_s20 = int_to_ptr.hbm [resolvable:$true] %s30_s20 }
   0x3   :  { %s32_s22 = sshll.u32 %s299_s21, 4  ;;  %s17_s25 = sshll.u32 %s370_s0, 4  ;;  %s33_s22 = int_to_ptr.vmem [resolvable:$true] %s32_s22  ;;  %s18_s25 = int_to_ptr.hbm [resolvable:$true] %s17_s25 }
   0x4   :  { %s300_s26 = smov 128   ;;  %s301_s27 = smov 8  }
   0x5   :  { %38 = dma.hbm_to_vmem [thread:$0]  %s31_s20, 256, %s33_s22, [#allocation6], %s300_s26, %s300_s26, %s301_s27  }
   0x6   :  { %s302_s28 = smov [#allocation2]   ;;  %s45_s1 = sshll.u32 %s373_s3, 4  ;;  %s46_s1 = int_to_ptr.hbm [resolvable:$true] %s45_s1 }
   0x7   :  { %s19_s29 = sshll.u32 %s302_s28, 4  ;;  %s303_s0 = smov [#allocation7]   ;;  %s20_s29 = int_to_ptr.vmem [resolvable:$true] %s19_s29 }
   0x8   :  { %25 = dma.hbm_to_vmem [thread:$0]  %s18_s25, 256, %s20_s29, [#allocation3], %s300_s26, %s300_s26, %s301_s27  }
   0x9   :  { %s47_s7 = sshll.u32 %s303_s0, 4  ;;  %s48_s7 = int_to_ptr.vmem [resolvable:$true] %s47_s7 }
   0xa   :  { %53 = dma.hbm_to_vmem [thread:$0]  %s46_s1, 256, %s48_s7, [#allocation6], %s300_s26, %s300_s26, %s301_s27  }
   0xb   :  { %293 = dma.done.wait [#allocation3], 256  }
   0xc   :  { %294 = vsyncadd [#allocation3], 4294967040 }
   0xd   :  { %295 = dma.done.wait [#allocation6], 512  }
   0xe   :  { %296 = vsyncadd [#allocation6], 4294966784  ;;  %vm76_vm0 = vcmask 130048   ;;  %v71_v0 = vld [vmem:[#allocation5 + $0x8] sm:$0xff]  ;;  %v121_v1 = vld [vmem:[#allocation7 + $0x8] sm:$0xff]  ;;  %vm128_vm1 = vcmask 1041409  }
   0xf   :  { %v70_v2 = vld [vmem:[#allocation5] sm:$0xff]  ;;  %187 = vmatpush.msra.mxu2 %v71_v0  ;;  %146 = vmatpush.msra.mxu1 %v121_v1  ;;  %v120_v3 = vld [vmem:[#allocation7] sm:$0xff]  ;;  %v69_v4 = vld [vmem:[#allocation2 + $0x8] sm:$0xff]  ;;  %vm161_vm2 = vcmask 261120   ;;  %s304_s11 = smov [#allocation8]  }
  0x10   :  { %v68_v5 = vld [vmem:[#allocation2] sm:$0xff]  ;;  %v113_v6 = vsel %vm76_vm0, %v69_v4, 0.0  ;;  %97 = vmatpush.msra.mxu0 %v71_v0  ;;  %s168_s12 = sshll.u32 %s304_s11, 4  ;;  %s169_s12 = int_to_ptr.vmem [resolvable:$true] %s168_s12 }
  0x11   :  { %v106_v7 = vsel %vm76_vm0, %v68_v5, 0.0  ;;  %188 = vmatpush.msra.mxu2 %v70_v2  ;;  %147 = vmatpush.msra.mxu1 %v120_v3  ;;  %v114_v8 = vrot.slane %v113_v6, 4  ;;  %v195_v21 = vld [vmem:[%s374_s4] ss:$0 sm:$0xff]  ;;  %s170_s4 = sshll.u32 %s375_s5, 4  ;;  %s171_s4 = int_to_ptr.hbm [resolvable:$true] %s170_s4 }
  0x12   :  { %v107_v9 = vrot.slane %v106_v7, 4  ;;  %185 = vmatmul.msk.f32.vlgmr.msra.gmra.mxu2 %vm76_vm0, %v69_v4  ;;  %98 = vmatpush.msra.mxu0 %v70_v2  ;;  %v196_v22 = vld [vmem:[%s372_s2] ss:$0 sm:$0xff] }
  0x13   :  { %v115_v10 = vadd.f32 %v114_v8, %v113_v6  ;;  %184 = vmatmul.msk.f32.vlgmr.msra.gmra.mxu0 %vm76_vm0, %v68_v5 }
  0x14   :  { %v108_v11 = vadd.f32 %v107_v9, %v106_v7 }
  0x15   :  { %v116_v12 = vrot.slane %v115_v10, 2 }
  0x16   :  { %v109_v13 = vrot.slane %v108_v11, 2 }
  0x17   :  { %v117_v14 = vadd.f32 %v116_v12, %v115_v10 }
  0x18   :  { %v110_v15 = vadd.f32 %v109_v13, %v108_v11 }
  0x19   :  { %v118_v16 = vrot.slane %v117_v14, 1 }
  0x1a   :  { %v111_v17 = vrot.slane %v110_v15, 1 }
  0x1b   :  { %v119_v19 = vadd.f32 %v118_v16, %v117_v14 }
  0x1c   :  { %v112_v18 = vadd.f32 %v111_v17, %v110_v15 }
  0x1e   :  { %v129_v20 = vsel %vm128_vm1, %v119_v19, %v112_v18 }
  0x1f   :  { %186 = vmatmul.msk.f32.vlgmr.msra.gmra.mxu1 %vm76_vm0, %v129_v20 }
  0x90   :  { %v100_v24 = vpop.f32.mrf.mxu0 }
  0x91   :  { %v101_v28 = vadd.f32 %v196_v22, %v100_v24 }
  0x95   :  { %v103_v26 = vpop.f32.mrf.mxu2 }
  0x96   :  { %v104_v31 = vadd.f32 %v196_v22, %v103_v26 }
  0x9c   :  { %v149_v23 = vpop.f32.mrf.mxu1 }
  0x9d   :  { %v150_v25 = vadd.f32 %v195_v21, %v149_v23 }
  0x9f   :  { %v152_v27 = vmul.f32 0.125, %v150_v25 }
  0xa1   :  { %v154_v29 = vrot.slane %v152_v27, 1  ;;  %v155_v30 = vperm.slane %v152_v27, 0 }
  0xa3   :  { %v156_v32 = vperm.slane %v154_v29, 0  ;;  %v159_v33 = vadd.f32 %v155_v30, %v101_v28 }
  0xa5   :  { %v160_v34 = vadd.f32 %v156_v32, %v104_v31  ;;  %162 = vst.msk [vmem:[#allocation8] sm:$0xff] %vm161_vm2, %v159_v33 }
  0xa7   :  { %163 = vst.msk [vmem:[#allocation8 + $0x8] sm:$0xff] %vm161_vm2, %v160_v34 }
  0xa8   :  { %176 = dma.vmem_to_hbm [thread:$0]  %s169_s12, 256, %s171_s4, [#allocation4], %s300_s26, %s300_s26, %s301_s27  }
  0xa9   :  { %297 = dma.done.wait [#allocation4], 256  }
  0xaa   :  { %298 = vsyncadd [#allocation4], 4294967040 }
  0xab   :  { %181 = vsyncpa [#allocation3], 1 }
  0xac   :  { %182 = vsyncpa [#allocation6], 1 }
  0xad   :  { %183 = vsyncpa [#allocation4], 1 }

</bundles_post_ra>
